<compile_context>
chip_gen: v7x
topology: tpu7x:2x2x1
jax: 0.10.0
libtpu: 0.0.40
codegen_flags: <defaults>
</compile_context>

<pallas_src>
import jax
import jax.numpy as jnp
from jax.experimental import pallas as pl
from jax.experimental.pallas import tpu as pltpu

LEAKY_SLOPE = 0.01   # torch.nn.LeakyReLU default negative_slope
BN_EPS = 1e-5        # torch.nn.BatchNorm1d default eps
MASK_NEG = -1.0e9    # -1000000000.0 in the reference module
OUT_PAD = 128        # lane-dense padded width of the final output slab


# ----------------------------- Pallas kernel --------------------------------
def mean_max_pooler_kernel(
    inv_cnt_ref, cls_ref, other_ref, mask_row_ref, mask_col_ref,
    w_mean_ref, w_max_ref, w_cls1_ref, w_cls2_ref, bias_ref,
    out_ref,
    sum_acc, max_acc, feats,
):
    s = pl.program_id(1)

    @pl.when(s == 0)
    def _init():
        sum_acc[...] = jnp.zeros_like(sum_acc)
        max_acc[...] = jnp.full_like(max_acc, MASK_NEG)

    other = other_ref[...]                                   # [Bt, St, H]

    # masked running sum on the MXU: [Bt,1,St] @ [Bt,St,H] -> [Bt,1,H]
    sum_acc[...] += jnp.einsum(
        "bts,bsh->bth", mask_row_ref[...], other,
        preferred_element_type=jnp.float32)[:, 0, :]

    # masked running max (sublane reduction folded into the accumulator)
    tile_max = jnp.max(
        jnp.where(mask_col_ref[...] > 0, other, MASK_NEG), axis=1)
    max_acc[...] = jnp.maximum(max_acc[...], tile_max)

    @pl.when(s == pl.num_programs(1) - 1)
    def _epilogue():
        H = cls_ref.shape[1]
        P = w_mean_ref.shape[1]
        C1 = w_cls1_ref.shape[1]
        out_w = w_cls2_ref.shape[1]

        bias = bias_ref[...]
        b_mean = bias[0:1, :P]
        b_max = bias[1:2, :P]
        b_cls1 = bias[2:3, :C1]
        b_cls2 = bias[3:4, :out_w]

        def leaky(y):
            return jnp.where(y > 0, y, LEAKY_SLOPE * y)

        mean_emb = sum_acc[...] * inv_cnt_ref[...]           # [Bt, H]
        max_emb = max_acc[...]                               # [Bt, H]

        mean_d = leaky(jnp.dot(mean_emb, w_mean_ref[...],
                               preferred_element_type=jnp.float32) + b_mean)
        max_d = leaky(jnp.dot(max_emb, w_max_ref[...],
                              preferred_element_type=jnp.float32) + b_max)

        # assemble [cls | mean_d | max_d] lane-dense, then ONE classifier matmul
        feats[:, :H] = cls_ref[...]
        feats[:, H:H + P] = mean_d
        feats[:, H + P:H + 2 * P] = max_d

        h1 = leaky(jnp.dot(feats[...], w_cls1_ref[...],
                           preferred_element_type=jnp.float32) + b_cls1)
        out = jnp.dot(h1, w_cls2_ref[...],
                      preferred_element_type=jnp.float32) + b_cls2
        out_ref[...] = out.astype(out_ref.dtype)             # [Bt, 128] lane-dense


# ------------------------------ JAX wrapper ----------------------------------
def mean_max_pooler(last_hidden_state, attention_mask, params):
    B, S, H = last_hidden_state.shape
    P = params["w_mean"].shape[1]
    C1 = params["w_cls1"].shape[1]
    n_out = params["w_cls2"].shape[1]
    F = H + 2 * P

    # glue: slicing / mask cast (matches the torch module: CLS token at index 1)
    cls_emb = last_hidden_state[:, 1, :]                     # [B, H]
    other = last_hidden_state[:, 1:, :]                      # [B, S-1, H]
    mask = attention_mask[:, 1:].astype(jnp.float32)         # [B, S-1]
    S1 = S - 1

    # guarded reciprocal of token counts (computed on the unpadded mask)
    cnt = jnp.sum(mask, axis=1, keepdims=True)               # [B, 1]
    inv_cnt = 1.0 / jnp.maximum(cnt, 1.0)

    # ---- batch tiling ("parallel" grid axis 0) ----
    if B <= 256:
        b_tile, B_pad = B, B
    else:
        b_tile = 256
        B_pad = ((B + b_tile - 1) // b_tile) * b_tile
    if B_pad != B:
        pad_b = B_pad - B
        cls_emb = jnp.pad(cls_emb, ((0, pad_b), (0, 0)))
        other = jnp.pad(other, ((0, pad_b), (0, 0), (0, 0)))
        mask = jnp.pad(mask, ((0, pad_b), (0, 0)))
        inv_cnt = jnp.pad(inv_cnt, ((0, pad_b), (0, 0)))
    n_b = B_pad // b_tile

    # ---- adaptive sequence tiling ("arbitrary" grid axis 1) ----
    # single tile if the (b_tile, S1, H) block fits the budget; otherwise
    # 128-aligned tiles sized to the budget (Pallas double-buffers each input).
    BLOCK_BUDGET = 4 * 1024 * 1024
    if 4 * b_tile * S1 * H <= BLOCK_BUDGET or S1 <= 128:
        s_tile = max(8, ((S1 + 7) // 8) * 8)
    else:
        s_tile = max(128, (BLOCK_BUDGET // (4 * b_tile * H)) // 128 * 128)
    s_pad = ((S1 + s_tile - 1) // s_tile) * s_tile
    if s_pad != S1:
        other = jnp.pad(other, ((0, 0), (0, s_pad - S1), (0, 0)))
        mask = jnp.pad(mask, ((0, 0), (0, s_pad - S1)))      # padded tokens masked out
    n_s = s_pad // s_tile

    mask_row = mask[:, None, :]                              # [B_pad, 1, s_pad]  (MXU lhs)
    mask_col = mask[:, :, None]                              # [B_pad, s_pad, 1]  (max select)

    # fold eval-mode BatchNorm1d into the Linear weights / biases
    def fold(w, b, bn):
        gamma, beta, rmean, rvar = bn
        scale = gamma / jnp.sqrt(rvar + BN_EPS)
        return w * scale[None, :], b * scale + (beta - rmean * scale)

    w_mean_f, b_mean_f = fold(params["w_mean"], params["b_mean"], params["bn_mean"])
    w_max_f, b_max_f = fold(params["w_max"], params["b_max"], params["bn_max"])
    w_cls1_f, b_cls1_f = fold(params["w_cls1"], params["b_cls1"], params["bn_cls1"])

    # final layer padded to a lane-dense 128-wide output slab
    w_cls2_p = jnp.zeros((C1, OUT_PAD), jnp.float32).at[:, :n_out].set(params["w_cls2"])
    b_cls2_p = jnp.zeros((OUT_PAD,), jnp.float32).at[:n_out].set(params["b_cls2"])

    # pack all bias vectors into one (4, BW) parameter block (one DMA, not four)
    BW = ((max(P, C1, OUT_PAD) + 127) // 128) * 128
    bias_pack = jnp.zeros((4, BW), jnp.float32)
    bias_pack = bias_pack.at[0, :P].set(b_mean_f)
    bias_pack = bias_pack.at[1, :P].set(b_max_f)
    bias_pack = bias_pack.at[2, :C1].set(b_cls1_f)
    bias_pack = bias_pack.at[3, :OUT_PAD].set(b_cls2_p)

    grid = (n_b, n_s)  # (batch blocks "parallel", sequence blocks "arbitrary")

    in_specs = [
        pl.BlockSpec((b_tile, 1), lambda b, s: (b, 0)),                 # inv_cnt
        pl.BlockSpec((b_tile, H), lambda b, s: (b, 0)),                 # cls_emb
        pl.BlockSpec((b_tile, s_tile, H), lambda b, s: (b, s, 0)),      # other
        pl.BlockSpec((b_tile, 1, s_tile), lambda b, s: (b, 0, s)),      # mask_row
        pl.BlockSpec((b_tile, s_tile, 1), lambda b, s: (b, s, 0)),      # mask_col
        pl.BlockSpec((H, P), lambda b, s: (0, 0)),                      # w_mean (BN folded)
        pl.BlockSpec((H, P), lambda b, s: (0, 0)),                      # w_max  (BN folded)
        pl.BlockSpec((F, C1), lambda b, s: (0, 0)),                     # w_cls1 (BN folded)
        pl.BlockSpec((C1, OUT_PAD), lambda b, s: (0, 0)),               # w_cls2 (padded)
        pl.BlockSpec((4, BW), lambda b, s: (0, 0)),                     # bias_pack
    ]
    out_spec = pl.BlockSpec((b_tile, OUT_PAD), lambda b, s: (b, 0))

    flops = (4 * B_pad * s_pad * H                   # masked sum (MXU) + max path
             + 2 * B_pad * H * P * 2                 # two down-size linears
             + 2 * B_pad * F * C1 + 2 * B_pad * C1 * OUT_PAD)
    bytes_accessed = 4 * (B_pad * s_pad * H + 2 * B_pad * s_pad + B_pad * H + B_pad
                          + 2 * H * P + F * C1 + C1 * OUT_PAD + 4 * BW
                          + B_pad * OUT_PAD)

    out_padded = pl.pallas_call(
        mean_max_pooler_kernel,
        out_shape=jax.ShapeDtypeStruct((B_pad, OUT_PAD), jnp.float32),
        grid_spec=pltpu.PrefetchScalarGridSpec(
            num_scalar_prefetch=0,
            grid=grid,
            in_specs=in_specs,
            out_specs=out_spec,
            scratch_shapes=[
                pltpu.VMEM((b_tile, H), jnp.float32),     # running masked sum
                pltpu.VMEM((b_tile, H), jnp.float32),     # running masked max
                pltpu.VMEM((b_tile, F), jnp.float32),     # [cls | mean_d | max_d]
            ],
        ),
        compiler_params=pltpu.CompilerParams(
            dimension_semantics=("parallel", "arbitrary")),
        cost_estimate=pl.CostEstimate(
            flops=int(flops), transcendentals=0,
            bytes_accessed=int(bytes_accessed)),
    )(inv_cnt, cls_emb, other, mask_row, mask_col,
      w_mean_f, w_max_f, w_cls1_f, w_cls2_p, bias_pack)

    return out_padded[:B, :n_out]


# --------------------------- reference (plain JAX) ---------------------------
def mean_max_pooler_ref(last_hidden_state, attention_mask, params):
    cls_emb = last_hidden_state[:, 1, :]
    other = last_hidden_state[:, 1:, :]
    mask = attention_mask[:, 1:].astype(jnp.float32)[:, :, None]

    mean_emb = jnp.sum(other * mask, axis=1) / jnp.sum(mask, axis=1)
    max_emb = jnp.max(jnp.where(mask > 0, other, MASK_NEG), axis=1)

    def block(x, w, b, bn):
        gamma, beta, rmean, rvar = bn
        y = x @ w + b
        y = (y - rmean) / jnp.sqrt(rvar + BN_EPS) * gamma + beta
        return jnp.where(y > 0, y, LEAKY_SLOPE * y)

    mean_d = block(mean_emb, params["w_mean"], params["b_mean"], params["bn_mean"])
    max_d = block(max_emb, params["w_max"], params["b_max"], params["bn_max"])
    feats = jnp.concatenate([cls_emb, mean_d, max_d], axis=1)
    h1 = block(feats, params["w_cls1"], params["b_cls1"], params["bn_cls1"])
    return h1 @ params["w_cls2"] + params["b_cls2"]


# ----------------------------- param construction ----------------------------
def init_params(key, hidden, pooled, perceptron_sizes):
    # perceptron_sizes = [hidden + 2*pooled, C1, 2]
    ks = list(jax.random.split(key, 16))

    def linear(kw, kb, fan_in, fan_out):
        bound = 1.0 / jnp.sqrt(fan_in)
        w = jax.random.uniform(kw, (fan_in, fan_out), jnp.float32, -bound, bound)
        b = jax.random.uniform(kb, (fan_out,), jnp.float32, -bound, bound)
        return w, b

    def bn(k, n):
        k1, k2, k3, k4 = jax.random.split(k, 4)
        gamma = 1.0 + 0.1 * jax.random.normal(k1, (n,), jnp.float32)
        beta = 0.1 * jax.random.normal(k2, (n,), jnp.float32)
        rmean = 0.1 * jax.random.normal(k3, (n,), jnp.float32)
        rvar = jax.random.uniform(k4, (n,), jnp.float32, 0.5, 1.5)
        return (gamma, beta, rmean, rvar)

    f_in, c1, c_out = perceptron_sizes
    assert f_in == hidden + 2 * pooled

    w_mean, b_mean = linear(ks[0], ks[1], hidden, pooled)
    w_max, b_max = linear(ks[2], ks[3], hidden, pooled)
    w_cls1, b_cls1 = linear(ks[4], ks[5], f_in, c1)
    w_cls2, b_cls2 = linear(ks[6], ks[7], c1, c_out)

    return dict(
        w_mean=w_mean, b_mean=b_mean, bn_mean=bn(ks[8], pooled),
        w_max=w_max, b_max=b_max, bn_max=bn(ks[9], pooled),
        w_cls1=w_cls1, b_cls1=b_cls1, bn_cls1=bn(ks[10], c1),
        w_cls2=w_cls2, b_cls2=b_cls2,
    )


if __name__ == "__main__":
    B, S, H = 2, 8, 32           # batch, seq, hidden
    P = 16                       # size_after_pooling
    PERCEPTRON = [H + 2 * P, 32, 2]

    key = jax.random.PRNGKey(0)
    k_x, k_p = jax.random.split(key)

    last_hidden_state = jax.random.normal(k_x, (B, S, H), jnp.float32)
    attention_mask = jnp.array(
        [[1, 1, 1, 1, 1, 1, 1, 1],
         [1, 1, 1, 1, 1, 0, 0, 0]], dtype=jnp.int32)

    params = init_params(k_p, H, P, PERCEPTRON)

    out = mean_max_pooler(last_hidden_state, attention_mask, params)
    out = jax.block_until_ready(out)

    ref = mean_max_pooler_ref(last_hidden_state, attention_mask, params)
    assert out.shape == (B, 2)
    assert jnp.allclose(out, ref, atol=1e-4, rtol=1e-4), (out, ref)

    print("KERNEL_OK")
</pallas_src>

<mosaic_0001>
module attributes {stable_mosaic.version = 11 : i64} {
  func.func @mean_max_pooler_kernel(%arg0: i32, %arg1: i32, %arg2: memref<2x1xf32, #tpu.memory_space<vmem>>, %arg3: memref<2x32xf32, #tpu.memory_space<vmem>>, %arg4: memref<2x8x32xf32, #tpu.memory_space<vmem>>, %arg5: memref<2x1x8xf32, #tpu.memory_space<vmem>>, %arg6: memref<2x8x1xf32, #tpu.memory_space<vmem>>, %arg7: memref<32x16xf32, #tpu.memory_space<vmem>>, %arg8: memref<32x16xf32, #tpu.memory_space<vmem>>, %arg9: memref<64x32xf32, #tpu.memory_space<vmem>>, %arg10: memref<32x128xf32, #tpu.memory_space<vmem>>, %arg11: memref<4x128xf32, #tpu.memory_space<vmem>>, %arg12: memref<2x128xf32, #tpu.memory_space<vmem>>, %arg13: memref<2x32xf32, #tpu.memory_space<vmem>>, %arg14: memref<2x32xf32, #tpu.memory_space<vmem>>, %arg15: memref<2x64xf32, #tpu.memory_space<vmem>>) attributes {dimension_semantics = [#tpu.dimension_semantics<parallel>, #tpu.dimension_semantics<arbitrary>], iteration_bounds = array<i64: 1, 1>, scalar_prefetch = 0 : i64, scratch_operands = 3 : i64, tpu.core_type = #tpu.core_type<tc>, window_params = [{transform_indices = @transform_0, window_bounds = array<i64: 2, 1>}, {transform_indices = @transform_1, window_bounds = array<i64: 2, 32>}, {transform_indices = @transform_2, window_bounds = array<i64: 2, 8, 32>}, {transform_indices = @transform_3, window_bounds = array<i64: 2, 1, 8>}, {transform_indices = @transform_4, window_bounds = array<i64: 2, 8, 1>}, {pipeline_mode = #tpu.pipeline_mode<synchronous>, transform_indices = @transform_5, window_bounds = array<i64: 32, 16>}, {pipeline_mode = #tpu.pipeline_mode<synchronous>, transform_indices = @transform_6, window_bounds = array<i64: 32, 16>}, {pipeline_mode = #tpu.pipeline_mode<synchronous>, transform_indices = @transform_7, window_bounds = array<i64: 64, 32>}, {pipeline_mode = #tpu.pipeline_mode<synchronous>, transform_indices = @transform_8, window_bounds = array<i64: 32, 128>}, {pipeline_mode = #tpu.pipeline_mode<synchronous>, transform_indices = @transform_9, window_bounds = array<i64: 4, 128>}, {transform_indices = @transform_10, window_bounds = array<i64: 2, 128>}]} {
    %c0_i32 = arith.constant 0 : i32
    %0 = arith.cmpi eq, %arg1, %c0_i32 : i32
    %1 = arith.extui %0 : i1 to i32
    %c0_i32_0 = arith.constant 0 : i32
    %2 = arith.cmpi ne, %1, %c0_i32_0 : i32
    scf.if %2 {
      %cst_22 = arith.constant 0.000000e+00 : f32
      %24 = vector.broadcast %cst_22 : f32 to vector<2x32xf32>
      %c0_23 = arith.constant 0 : index
      %c0_24 = arith.constant 0 : index
      %25 = vector.load %arg13[%c0_23, %c0_24] : memref<2x32xf32, #tpu.memory_space<vmem>>, vector<2x32xf32>
      tpu.vector_store %arg13[%c0_23, %c0_24], %24 {strides = array<i32>} : memref<2x32xf32, #tpu.memory_space<vmem>>, vector<2x32xf32>,
      %cst_25 = arith.constant -1.000000e+09 : f32
      %26 = vector.broadcast %cst_25 : f32 to vector<2x32xf32>
      %c0_26 = arith.constant 0 : index
      %c0_27 = arith.constant 0 : index
      %27 = vector.load %arg14[%c0_26, %c0_27] : memref<2x32xf32, #tpu.memory_space<vmem>>, vector<2x32xf32>
      tpu.vector_store %arg14[%c0_26, %c0_27], %26 {strides = array<i32>} : memref<2x32xf32, #tpu.memory_space<vmem>>, vector<2x32xf32>,
    } else {
    }
    %c0 = arith.constant 0 : index
    %c0_1 = arith.constant 0 : index
    %c0_2 = arith.constant 0 : index
    %3 = vector.load %arg4[%c0, %c0_1, %c0_2] : memref<2x8x32xf32, #tpu.memory_space<vmem>>, vector<2x8x32xf32>
    %c0_3 = arith.constant 0 : index
    %c0_4 = arith.constant 0 : index
    %4 = vector.load %arg13[%c0_3, %c0_4] : memref<2x32xf32, #tpu.memory_space<vmem>>, vector<2x32xf32>
    %c0_5 = arith.constant 0 : index
    %c0_6 = arith.constant 0 : index
    %c0_7 = arith.constant 0 : index
    %5 = vector.load %arg5[%c0_5, %c0_6, %c0_7] : memref<2x1x8xf32, #tpu.memory_space<vmem>>, vector<2x1x8xf32>
    "tpu.trace_start"() <{level = 10 : i32, message = "bts,bsh->bth"}> : () -> ()
    %cst = arith.constant dense<0.000000e+00> : vector<2x1x32xf32>
    %6 = tpu.matmul %5, %3, %cst {dimension_numbers = #tpu.dot_dimension_numbers<[2], [1], [1], [2], [0, 0, 0, 1, 1, 2], [0], [0]>} : vector<2x1x8xf32>, vector<2x8x32xf32>, vector<2x1x32xf32> -> vector<2x1x32xf32>
    "tpu.trace_stop"() : () -> ()
    %7 = vector.shape_cast %6 : vector<2x1x32xf32> to vector<2x32xf32>
    %8 = arith.addf %4, %7 : vector<2x32xf32>
    %c0_8 = arith.constant 0 : index
    %c0_9 = arith.constant 0 : index
    %9 = vector.load %arg13[%c0_8, %c0_9] : memref<2x32xf32, #tpu.memory_space<vmem>>, vector<2x32xf32>
    tpu.vector_store %arg13[%c0_8, %c0_9], %8 {strides = array<i32>} : memref<2x32xf32, #tpu.memory_space<vmem>>, vector<2x32xf32>,
    %c0_10 = arith.constant 0 : index
    %c0_11 = arith.constant 0 : index
    %c0_12 = arith.constant 0 : index
    %10 = vector.load %arg6[%c0_10, %c0_11, %c0_12] : memref<2x8x1xf32, #tpu.memory_space<vmem>>, vector<2x8x1xf32>
    %cst_13 = arith.constant 0.000000e+00 : f32
    %11 = vector.broadcast %cst_13 : f32 to vector<2x8x1xf32>
    %12 = arith.cmpf ogt, %10, %11 : vector<2x8x1xf32>
    %cst_14 = arith.constant -1.000000e+09 : f32
    %13 = vector.shape_cast %12 : vector<2x8x1xi1> to vector<2x8x1xi1>
    %14 = vector.broadcast %13 : vector<2x8x1xi1> to vector<2x8x32xi1>
    %15 = vector.broadcast %cst_14 : f32 to vector<2x8x32xf32>
    %16 = arith.select %14, %3, %15 : vector<2x8x32xi1>, vector<2x8x32xf32>
    %cst_15 = arith.constant dense<0xFF800000> : vector<2x32xf32>
    %17 = vector.multi_reduction <maximumf>, %16, %cst_15 [1] : vector<2x8x32xf32> to vector<2x32xf32>
    %c0_16 = arith.constant 0 : index
    %c0_17 = arith.constant 0 : index
    %18 = vector.load %arg14[%c0_16, %c0_17] : memref<2x32xf32, #tpu.memory_space<vmem>>, vector<2x32xf32>
    %19 = arith.maximumf %18, %17 : vector<2x32xf32>
    %c0_18 = arith.constant 0 : index
    %c0_19 = arith.constant 0 : index
    %20 = vector.load %arg14[%c0_18, %c0_19] : memref<2x32xf32, #tpu.memory_space<vmem>>, vector<2x32xf32>
    tpu.vector_store %arg14[%c0_18, %c0_19], %19 {strides = array<i32>} : memref<2x32xf32, #tpu.memory_space<vmem>>, vector<2x32xf32>,
    %c0_i32_20 = arith.constant 0 : i32
    %21 = arith.cmpi eq, %arg1, %c0_i32_20 : i32
    %22 = arith.extui %21 : i1 to i32
    %c0_i32_21 = arith.constant 0 : i32
    %23 = arith.cmpi ne, %22, %c0_i32_21 : i32
    scf.if %23 {
      %c0_22 = arith.constant 0 : index
      %c0_23 = arith.constant 0 : index
      %24 = vector.load %arg11[%c0_22, %c0_23] : memref<4x128xf32, #tpu.memory_space<vmem>>, vector<4x128xf32>
      %25 = vector.extract_strided_slice %24 {offsets = [0, 0], sizes = [1, 16], strides = [1, 1]} : vector<4x128xf32> to vector<1x16xf32>
      %26 = vector.extract_strided_slice %24 {offsets = [1, 0], sizes = [1, 16], strides = [1, 1]} : vector<4x128xf32> to vector<1x16xf32>
      %27 = vector.extract_strided_slice %24 {offsets = [2, 0], sizes = [1, 32], strides = [1, 1]} : vector<4x128xf32> to vector<1x32xf32>
      %28 = vector.extract_strided_slice %24 {offsets = [3, 0], sizes = [1, 128], strides = [1, 1]} : vector<4x128xf32> to vector<1x128xf32>
      %c0_24 = arith.constant 0 : index
      %c0_25 = arith.constant 0 : index
      %29 = vector.load %arg13[%c0_24, %c0_25] : memref<2x32xf32, #tpu.memory_space<vmem>>, vector<2x32xf32>
      %c0_26 = arith.constant 0 : index
      %c0_27 = arith.constant 0 : index
      %30 = vector.load %arg2[%c0_26, %c0_27] : memref<2x1xf32, #tpu.memory_space<vmem>>, vector<2x1xf32>
      %31 = vector.broadcast %30 : vector<2x1xf32> to vector<2x32xf32>
      %32 = arith.mulf %29, %31 : vector<2x32xf32>
      %c0_28 = arith.constant 0 : index
      %c0_29 = arith.constant 0 : index
      %33 = vector.load %arg14[%c0_28, %c0_29] : memref<2x32xf32, #tpu.memory_space<vmem>>, vector<2x32xf32>
      %c0_30 = arith.constant 0 : index
      %c0_31 = arith.constant 0 : index
      %34 = vector.load %arg7[%c0_30, %c0_31] : memref<32x16xf32, #tpu.memory_space<vmem>>, vector<32x16xf32>
      %cst_32 = arith.constant dense<0.000000e+00> : vector<2x16xf32>
      %35 = tpu.matmul %32, %34, %cst_32 {dimension_numbers = #tpu.dot_dimension_numbers<[1], [0], [0], [1], [0, 0, 1, 1], [], []>} : vector<2x32xf32>, vector<32x16xf32>, vector<2x16xf32> -> vector<2x16xf32>
      %36 = vector.broadcast %25 : vector<1x16xf32> to vector<2x16xf32>
      %37 = arith.addf %35, %36 : vector<2x16xf32>
      %cst_33 = arith.constant 0.000000e+00 : f32
      %38 = vector.broadcast %cst_33 : f32 to vector<2x16xf32>
      %39 = arith.cmpf ogt, %37, %38 : vector<2x16xf32>
      %cst_34 = arith.constant 0.00999999977 : f32
      %40 = vector.broadcast %cst_34 : f32 to vector<2x16xf32>
      %41 = arith.mulf %40, %37 : vector<2x16xf32>
      %42 = arith.select %39, %37, %41 : vector<2x16xi1>, vector<2x16xf32>
      %c0_35 = arith.constant 0 : index
      %c0_36 = arith.constant 0 : index
      %43 = vector.load %arg8[%c0_35, %c0_36] : memref<32x16xf32, #tpu.memory_space<vmem>>, vector<32x16xf32>
      %cst_37 = arith.constant dense<0.000000e+00> : vector<2x16xf32>
      %44 = tpu.matmul %33, %43, %cst_37 {dimension_numbers = #tpu.dot_dimension_numbers<[1], [0], [0], [1], [0, 0, 1, 1], [], []>} : vector<2x32xf32>, vector<32x16xf32>, vector<2x16xf32> -> vector<2x16xf32>
      %45 = vector.broadcast %26 : vector<1x16xf32> to vector<2x16xf32>
      %46 = arith.addf %44, %45 : vector<2x16xf32>
      %cst_38 = arith.constant 0.000000e+00 : f32
      %47 = vector.broadcast %cst_38 : f32 to vector<2x16xf32>
      %48 = arith.cmpf ogt, %46, %47 : vector<2x16xf32>
      %cst_39 = arith.constant 0.00999999977 : f32
      %49 = vector.broadcast %cst_39 : f32 to vector<2x16xf32>
      %50 = arith.mulf %49, %46 : vector<2x16xf32>
      %51 = arith.select %48, %46, %50 : vector<2x16xi1>, vector<2x16xf32>
      %c0_40 = arith.constant 0 : index
      %c0_41 = arith.constant 0 : index
      %52 = vector.load %arg3[%c0_40, %c0_41] : memref<2x32xf32, #tpu.memory_space<vmem>>, vector<2x32xf32>
      %c0_42 = arith.constant 0 : index
      %c0_43 = arith.constant 0 : index
      %53 = vector.load %arg15[%c0_42, %c0_43] : memref<2x64xf32, #tpu.memory_space<vmem>>, vector<2x32xf32>
      tpu.vector_store %arg15[%c0_42, %c0_43], %52 {strides = array<i32>} : memref<2x64xf32, #tpu.memory_space<vmem>>, vector<2x32xf32>,
      %c0_44 = arith.constant 0 : index
      %c32 = arith.constant 32 : index
      %54 = vector.load %arg15[%c0_44, %c32] : memref<2x64xf32, #tpu.memory_space<vmem>>, vector<2x16xf32>
      tpu.vector_store %arg15[%c0_44, %c32], %42 {strides = array<i32>} : memref<2x64xf32, #tpu.memory_space<vmem>>, vector<2x16xf32>,
      %c0_45 = arith.constant 0 : index
      %c48 = arith.constant 48 : index
      %55 = vector.load %arg15[%c0_45, %c48] : memref<2x64xf32, #tpu.memory_space<vmem>>, vector<2x16xf32>
      tpu.vector_store %arg15[%c0_45, %c48], %51 {strides = array<i32>} : memref<2x64xf32, #tpu.memory_space<vmem>>, vector<2x16xf32>,
      %c0_46 = arith.constant 0 : index
      %c0_47 = arith.constant 0 : index
      %56 = vector.load %arg15[%c0_46, %c0_47] : memref<2x64xf32, #tpu.memory_space<vmem>>, vector<2x64xf32>
      %c0_48 = arith.constant 0 : index
      %c0_49 = arith.constant 0 : index
      %57 = vector.load %arg9[%c0_48, %c0_49] : memref<64x32xf32, #tpu.memory_space<vmem>>, vector<64x32xf32>
      %cst_50 = arith.constant dense<0.000000e+00> : vector<2x32xf32>
      %58 = tpu.matmul %56, %57, %cst_50 {dimension_numbers = #tpu.dot_dimension_numbers<[1], [0], [0], [1], [0, 0, 1, 1], [], []>} : vector<2x64xf32>, vector<64x32xf32>, vector<2x32xf32> -> vector<2x32xf32>
      %59 = vector.broadcast %27 : vector<1x32xf32> to vector<2x32xf32>
      %60 = arith.addf %58, %59 : vector<2x32xf32>
      %cst_51 = arith.constant 0.000000e+00 : f32
      %61 = vector.broadcast %cst_51 : f32 to vector<2x32xf32>
      %62 = arith.cmpf ogt, %60, %61 : vector<2x32xf32>
      %cst_52 = arith.constant 0.00999999977 : f32
      %63 = vector.broadcast %cst_52 : f32 to vector<2x32xf32>
      %64 = arith.mulf %63, %60 : vector<2x32xf32>
      %65 = arith.select %62, %60, %64 : vector<2x32xi1>, vector<2x32xf32>
      %c0_53 = arith.constant 0 : index
      %c0_54 = arith.constant 0 : index
      %66 = vector.load %arg10[%c0_53, %c0_54] : memref<32x128xf32, #tpu.memory_space<vmem>>, vector<32x128xf32>
      %cst_55 = arith.constant dense<0.000000e+00> : vector<2x128xf32>
      %67 = tpu.matmul %65, %66, %cst_55 {dimension_numbers = #tpu.dot_dimension_numbers<[1], [0], [0], [1], [0, 0, 1, 1], [], []>} : vector<2x32xf32>, vector<32x128xf32>, vector<2x128xf32> -> vector<2x128xf32>
      %68 = vector.broadcast %28 : vector<1x128xf32> to vector<2x128xf32>
      %69 = arith.addf %67, %68 : vector<2x128xf32>
      %c0_56 = arith.constant 0 : index
      %c0_57 = arith.constant 0 : index
      %70 = vector.load %arg12[%c0_56, %c0_57] : memref<2x128xf32, #tpu.memory_space<vmem>>, vector<2x128xf32>
      tpu.vector_store %arg12[%c0_56, %c0_57], %69 {strides = array<i32>} : memref<2x128xf32, #tpu.memory_space<vmem>>, vector<2x128xf32>,
    } else {
    }
    return
  }
  func.func @transform_0(%arg0: i32, %arg1: i32) -> (i32, i32) {
    %c0_i32 = arith.constant 0 : i32
    %c0_i32_0 = arith.constant 0 : i32
    return %arg0, %c0_i32 : i32, i32
  }
  func.func @transform_1(%arg0: i32, %arg1: i32) -> (i32, i32) {
    %c0_i32 = arith.constant 0 : i32
    %c0_i32_0 = arith.constant 0 : i32
    return %arg0, %c0_i32 : i32, i32
  }
  func.func @transform_2(%arg0: i32, %arg1: i32) -> (i32, i32, i32) {
    %c0_i32 = arith.constant 0 : i32
    %c0_i32_0 = arith.constant 0 : i32
    return %arg0, %arg1, %c0_i32 : i32, i32, i32
  }
  func.func @transform_3(%arg0: i32, %arg1: i32) -> (i32, i32, i32) {
    %c0_i32 = arith.constant 0 : i32
    %c0_i32_0 = arith.constant 0 : i32
    return %arg0, %c0_i32, %arg1 : i32, i32, i32
  }
  func.func @transform_4(%arg0: i32, %arg1: i32) -> (i32, i32, i32) {
    %c0_i32 = arith.constant 0 : i32
    %c0_i32_0 = arith.constant 0 : i32
    return %arg0, %arg1, %c0_i32 : i32, i32, i32
  }
  func.func @transform_5(%arg0: i32, %arg1: i32) -> (i32, i32) {
    %c0_i32 = arith.constant 0 : i32
    %c0_i32_0 = arith.constant 0 : i32
    %c0_i32_1 = arith.constant 0 : i32
    return %c0_i32, %c0_i32_0 : i32, i32
  }
  func.func @transform_6(%arg0: i32, %arg1: i32) -> (i32, i32) {
    %c0_i32 = arith.constant 0 : i32
    %c0_i32_0 = arith.constant 0 : i32
    %c0_i32_1 = arith.constant 0 : i32
    return %c0_i32, %c0_i32_0 : i32, i32
  }
  func.func @transform_7(%arg0: i32, %arg1: i32) -> (i32, i32) {
    %c0_i32 = arith.constant 0 : i32
    %c0_i32_0 = arith.constant 0 : i32
    %c0_i32_1 = arith.constant 0 : i32
    return %c0_i32, %c0_i32_0 : i32, i32
  }
  func.func @transform_8(%arg0: i32, %arg1: i32) -> (i32, i32) {
    %c0_i32 = arith.constant 0 : i32
    %c0_i32_0 = arith.constant 0 : i32
    %c0_i32_1 = arith.constant 0 : i32
    return %c0_i32, %c0_i32_0 : i32, i32
  }
  func.func @transform_9(%arg0: i32, %arg1: i32) -> (i32, i32) {
    %c0_i32 = arith.constant 0 : i32
    %c0_i32_0 = arith.constant 0 : i32
    %c0_i32_1 = arith.constant 0 : i32
    return %c0_i32, %c0_i32_0 : i32, i32
  }
  func.func @transform_10(%arg0: i32, %arg1: i32) -> (i32, i32) {
    %c0_i32 = arith.constant 0 : i32
    %c0_i32_0 = arith.constant 0 : i32
    return %arg0, %c0_i32 : i32, i32
  }
}

</mosaic_0001>

<bundles_post_ra>
// kernel: tpu_custom_call.1
= control target key start
LH: loop header
LB: loop body
LE: loop exit
PB: predicated region body
PF: predicated region fallthrough
CT: control target
= control target key end

     0   :  { %vm48_vm0 = vcmask 64512   ;;  %v783_v2 = vmov 0.0   ;;  %vm784_vm1 = vmmov 0   ;;  %v785_v5 = vmov 0   ;;  %s994_s0 = inlined_call_operand.vmem [shape: f32[2,1], index: 0, kind: input, shape index: {}]   ;;  %s995_s1 = inlined_call_operand.vmem [shape: f32[2,32], index: 1, kind: input, shape index: {}]   ;;  %s996_s2 = inlined_call_operand.vmem [shape: f32[2,8,32], index: 2, kind: input, shape index: {}]   ;;  %s997_s3 = inlined_call_operand.vmem [shape: f32[2,1,8], index: 3, kind: input, shape index: {}]   ;;  %s998_s4 = inlined_call_operand.vmem [shape: f32[2,8,1], index: 4, kind: input, shape index: {}]   ;;  %s999_s5 = inlined_call_operand.vmem [shape: f32[32,16], index: 5, kind: input, shape index: {}]   ;;  %s1000_s6 = inlined_call_operand.vmem [shape: f32[32,16], index: 6, kind: input, shape index: {}]   ;;  %s1001_s7 = inlined_call_operand.vmem [shape: f32[64,32], index: 7, kind: input, shape index: {}]   ;;  %s1002_s8 = inlined_call_operand.vmem [shape: f32[32,128], index: 8, kind: input, shape index: {}]   ;;  %s1003_s9 = inlined_call_operand.vmem [shape: f32[4,128], index: 9, kind: input, shape index: {}]   ;;  %s1004_s10 = inlined_call_operand.hbm [shape: f32[2,128], index: 10, kind: output, shape index: {}]  }
   0x1   :  { %v43_v0 = vld [vmem:[%s996_s2] sm:$0xff]  ;;  %657 = vmatprep.subr.mxu1 %v783_v2  ;;  %659 = vmatprep.mubr.msk.f32.mxu1 %vm784_vm1, %v783_v2  ;;  %v44_v3 = vld [vmem:[%s996_s2 + $0x8] sm:$0xff] }
   0x2   :  { %v46_v1 = vld [vmem:[%s997_s3] sm:$0x1]  ;;  %658 = vmatpush3.msra.mxu1 %v43_v0  ;;  %757 = vset.pattern.permute.xlu0 %v785_v5  ;;  %v205_v6 = vld [vmem:[%s998_s4 + $0x8] sm:$0xff] }
   0x3   :  { %v204_v4 = vld [vmem:[%s998_s4] sm:$0xff] }
   0x4   :  { %vm206_vm2 = vcmp.gt.f32.partialorder %v204_v4, 0.0 }
   0x5   :  { %15 = vsyncpa [#allocation6], 0  ;;  %660 = vmatmul.mubr.msk.f32.vlgmr.msra.gmra.mrb[0].mxu1 %vm48_vm0, %v46_v1  ;;  %662 = vmatprep.subr.mxu1 %v783_v2  ;;  %v208_v7 = vsel %vm206_vm2, 1, %v785_v5  ;;  %vm207_vm3 = vcmp.gt.f32.partialorder %v205_v6, 0.0  ;;  %v247_v8 = vld [vmem:[%s994_s0] sm:$0x3]  ;;  %v259_v58 = vlaneseq }
   0x6   :  { %663 = vmatpush3.msra.mxu1 %v44_v3  ;;  %664 = vmatprep.mubr.msk.f32.mxu1 %vm784_vm1, %v783_v2  ;;  %v47_v9 = vld [vmem:[%s997_s3 + $0x1] sm:$0x1]  ;;  %v209_v10 = vsel %vm207_vm3, 1, %v785_v5  ;;  %vm40_vm4 = vcmask 254976   ;;  %v786_v11 = vmov -1e+09  }
   0x7   :  { %211 = vperm.xlu0 %757, %v208_v7   ;;  %758 = vset.pattern.permute.xlu1 %v785_v5  ;;  %41 = vst.msk [vmem:[#allocation2] sm:$0x3] %vm40_vm4, %v783_v2  ;;  %42 = vst.msk [vmem:[#allocation3] sm:$0x3] %vm40_vm4, %v786_v11  ;;  %v339_v12 = vld [vmem:[%s1000_s6] sm:$0xff]  ;;  %v340_v13 = vld [vmem:[%s1000_s6 + $0x8] sm:$0xff] }
   0x8   :  { %250 = vperm.xlu1 %758, %v247_v8   ;;  %675 = vmatprep.mubr.msk.f32.mxu0 %vm784_vm1, %v783_v2  ;;  %v726_v14 = vpack.c.bf16 %v340_v13, %v339_v12  ;;  %v787_v15 = vmov 0.0|0.0   ;;  %v341_v16 = vld [vmem:[%s1000_s6 + $0x10] sm:$0xff]  ;;  %v342_v17 = vld [vmem:[%s1000_s6 + $0x18] sm:$0xff]  ;;  %v255_v19 = vld [vmem:[%s999_s5] sm:$0xff]  ;;  %vm220_vm5 = vcmask 261120   ;;  %vm198_vm8 = vcmask 1041409  }
   0x9   :  { %665 = vmatmul.mubr.msk.f32.vlgmr.msra.gmra.mrb[2].mxu1 %vm48_vm0, %v47_v9  ;;  %725 = vmatprep.subr.bf16.mxu1 %v787_v15  ;;  %v729_v18 = vpack.c.bf16 %v342_v17, %v341_v16  ;;  %v256_v20 = vld [vmem:[%s999_s5 + $0x8] sm:$0xff]  ;;  %v257_v21 = vld [vmem:[%s999_s5 + $0x10] sm:$0xff]  ;;  %v258_v23 = vld [vmem:[%s999_s5 + $0x18] sm:$0xff]  ;;  %v922_v59 = vshrl.u32 %v259_v58, 7  ;;  %vm429_vm11 = vcmask 386304   ;;  %vm435_vm12 = vcmask 517504  }
   0xa   :  { %686 = vmatprep.mubr.msk.f32.mxu1 %vm784_vm1, %v783_v2  ;;  %719 = vmatprep.subr.bf16.mxu0 %v787_v15  ;;  %v720_v22 = vpack.c.bf16 %v256_v20, %v255_v19  ;;  %v723_v24 = vpack.c.bf16 %v258_v23, %v257_v21  ;;  %v438_v60 = vld [vmem:[%s1001_s7] sm:$0xff]  ;;  %v439_v61 = vld [vmem:[%s1001_s7 + $0x8] sm:$0xff]  ;;  %v440_v62 = vld [vmem:[%s1001_s7 + $0x10] sm:$0xff]  ;;  %vm450_vm13 = vcmask 523264   ;;  %s790_s6 = smov [#allocation5]  }
   0xb   :  { %214 = vperm.xlu0 %757, %v209_v10   ;;  %727 = vmatpush3.bf16.msra.mxu1 %v726_v14  ;;  %v345_v63 = vsub.s32 1, %v922_v59  ;;  %v441_v1 = vld [vmem:[%s1001_s7 + $0x18] sm:$0xff]  ;;  %v442_v11 = vld [vmem:[%s1001_s7 + $0x20] sm:$0xff]  ;;  %v443_v12 = vld [vmem:[%s1001_s7 + $0x28] sm:$0xff]  ;;  %v261_v13 = vsub.s32 0, %v922_v59 }
   0xc   :  { %728 = vmatprep.subr.bf16.mxu1 %v787_v15  ;;  %721 = vmatpush3.bf16.msra.mxu0 %v720_v22  ;;  %v735_v4 = vpack.c.bf16 %v441_v1, %v440_v62  ;;  %v738_v14 = vpack.c.bf16 %v443_v12, %v442_v11  ;;  %v444_v16 = vld [vmem:[%s1001_s7 + $0x30] sm:$0xff]  ;;  %v445_v17 = vld [vmem:[%s1001_s7 + $0x38] sm:$0xff]  ;;  %v527_v23 = vld [vmem:[%s1002_s8] sm:$0xff]  ;;  %s789_s7 = smov 32  }
   0xd   :  { %722 = vmatprep.subr.bf16.mxu0 %v787_v15 }
   0xe   :  { %v235_v43 = vld [vmem:[#allocation3] sm:$0x3]  ;;  %v45_v50 = vld [vmem:[#allocation2] sm:$0x3] }
   0xf   :  { %730 = vmatpush3.bf16.msra.mxu1 %v729_v18  ;;  %v741_v18 = vpack.c.bf16 %v445_v17, %v444_v16 }
  0x10   :  { %743 = vmatprep.subr.bf16.mxu1 %v787_v15  ;;  %724 = vmatpush3.bf16.msra.mxu0 %v723_v24  ;;  %v528_v24 = vld [vmem:[%s1002_s8 + $0x8] sm:$0xff] }
  0x11   :  { %731 = vmatprep.subr.bf16.mxu0 %v787_v15 }
  0x86   :  { %v212_v25 = vpop.permute.xlu0 %211 }
  0x87   :  { %vm216_vm6 = vcmp.eq.s32.totalorder %v212_v25, 1  ;;  %v251_v55 = vpop.permute.xlu1 %250 }
  0x88   :  { %v218_v26 = vsel %vm216_vm6, %v43_v0, -1e+09  ;;  %v732_v0 = vpack.c.bf16 %v439_v61, %v438_v60 }
  0x89   :  { %v221_v27 = vsel %vm220_vm5, %v218_v26, -inf  ;;  %v744_v26 = vpack.c.bf16 %v528_v24, %v527_v23 }
  0x8a   :  { %v222_v28 = vrot.slane %v221_v27, 4  ;;  %v215_v29 = vpop.permute.xlu0 %214 }
  0x8b   :  { %vm217_vm7 = vcmp.eq.s32.totalorder %v215_v29, 1 }
  0x8c   :  { %v223_v30 = vmax.f32 %v221_v27, %v222_v28  ;;  %v219_v31 = vsel %vm217_vm7, %v44_v3, -1e+09  ;;  %v943_v3 = vld [vmem:[%s1003_s9] sm:$0xf] }
  0x8d   :  { %v228_v32 = vsel %vm220_vm5, %v219_v31, -inf  ;;  %v346_v5 = vrot.slane %v943_v3, %v345_v63  ;;  %v262_v19 = vrot.slane %v943_v3, %v261_v13  ;;  %v529_v31 = vld [vmem:[%s1002_s8 + $0x10] sm:$0xff] }
  0x8e   :  { %v224_v33 = vrot.slane %v223_v30, 2  ;;  %v229_v34 = vrot.slane %v228_v32, 4 }
  0x90   :  { %v225_v35 = vmax.f32 %v223_v30, %v224_v33  ;;  %v230_v36 = vmax.f32 %v228_v32, %v229_v34  ;;  %v530_v32 = vld [vmem:[%s1002_s8 + $0x18] sm:$0xff]  ;;  %s615_s8 = sshll.u32 %s790_s6, 4  ;;  %s616_s8 = int_to_ptr.vmem [resolvable:$true] %s615_s8 }
  0x91   :  { %v747_v33 = vpack.c.bf16 %v530_v32, %v529_v31  ;;  %s759_s19 = scalar_lea.vmem %s616_s8, 32  ;;  %p764_p1 = scmp.lt.s32.totalorder %s616_s8, %s616_s8 }
  0x92   :  { %v226_v37 = vrot.slane %v225_v35, 1  ;;  %v231_v38 = vrot.slane %v230_v36, 2  ;;  %p760_p0 = scmp.ne.s32.totalorder %s616_s8, %s759_s19  ;;  %p765_p2 = scmp.lt.s32.totalorder %s759_s19, %s759_s19 }
  0x94   :  { %v232_v39 = vmax.f32 %v230_v36, %v231_v38  ;;  %v227_v40 = vmax.f32 %v225_v35, %v226_v37  ;;  %p766_p3 = por %p765_p2, %p764_p1 }
  0x96   :  { %v233_v41 = vrot.slane %v232_v39, 1  ;;  %p767_p4 = pnand %p766_p3, %p760_p0 }
  0x98   :  { %v234_v42 = vmax.f32 %v232_v39, %v233_v41 }
  0x9a   :  { %v238_v44 = vsel %vm198_vm8, %v234_v42, %v227_v40  ;;  %v533_v40 = vsub.s32 3, %v922_v59 }
  0x9b   :  { %v240_v45 = vmax.f32 %v235_v43, %v238_v44 }
  0x9c   :  { %v534_v41 = vrot.slane %v943_v3, %v533_v40 }
  0x9d   :  { %241 = vst.msk [vmem:[#allocation3] sm:$0x3] %vm40_vm4, %v240_v45 }
  0xa4   :  { %v254_v46 = vld [vmem:[#allocation3] sm:$0x3] }
  0xa5   :  { %687 = vmatmul.mubr.msk.f32.vlgmr.msra.gmra.mrb[4].mxu1 %vm220_vm5, %v254_v46 }
  0xa6   :  { %716 = vmatprep.mubr.msk.f32.mxu1 %vm784_vm1, %v783_v2  ;;  %745 = vmatpush3.bf16.msra.mxu1 %v744_v26 }
  0xa7   :  { %746 = vmatprep.subr.bf16.mxu1 %v787_v15 }
  0xaa   :  { %748 = vmatpush3.bf16.msra.mxu1 %v747_v33 }
  0xd8   :  { %v118_v47 = vpop.f32.mrb[0].mxu1 }
  0xd9   :  { %v661_v48 = vpop.f32.mrb[1].mxu1 }
  0xdc   :  { %v191_v49 = vpop.f32.mrb[2].mxu1 }
  0xdd   :  { %v197_v51 = vrot.slane %v191_v49, 7  ;;  %v666_v52 = vpop.f32.mrb[3].mxu1 }
  0xdf   :  { %v199_v53 = vsel %vm198_vm8, %v197_v51, %v118_v47 }
  0xe0   :  { %v201_v54 = vadd.f32 %v199_v53, %v45_v50 }
  0xe2   :  { %203 = vst.msk [vmem:[#allocation2] sm:$0x3] %vm40_vm4, %v201_v54 }
  0xe9   :  { %v246_v56 = vld [vmem:[#allocation2] sm:$0x3] }
  0xea   :  { %v253_v57 = vmul.f32 %v251_v55, %v246_v56 }
  0xec   :  { %676 = vmatmul.mubr.msk.f32.vlgmr.msra.gmra.mrb[0].mxu0 %vm220_vm5, %v253_v57 }
  0xed   :  { %705 = vmatprep.mubr.msk.f32.mxu0 %vm784_vm1, %v783_v2  ;;  %v423_v2 = vld [vmem:[%s995_s1] sm:$0x3]  ;;  %733 = vmatpush3.bf16.msra.mxu0 %v732_v0  ;;  %s788_s1 = smov 48  }
  0xee   :  { %424 = vst.msk [vmem:[#allocation4] sm:$0x3] %vm40_vm4, %v423_v2  ;;  %734 = vmatprep.subr.bf16.mxu0 %v787_v15 }
  0xf1   :  { %736 = vmatpush3.bf16.msra.mxu0 %v735_v4 }
  0xf2   :  { %737 = vmatprep.subr.bf16.mxu0 %v787_v15 }
  0xf5   :  { %739 = vmatpush3.bf16.msra.mxu0 %v738_v14 }
  0xf6   :  { %740 = vmatprep.subr.bf16.mxu0 %v787_v15  ;;  %v448_v15 = vsub.s32 2, %v922_v59 }
  0xf8   :  { %v449_v34 = vrot.slane %v943_v3, %v448_v15 }
  0xf9   :  { %742 = vmatpush3.bf16.msra.mxu0 %v741_v18 }
 0x178   :  { %v416_v6 = vpop.f32.mrb[4].mxu1 }
 0x179   :  { %v417_v7 = vadd.f32 %v416_v6, %v346_v5  ;;  %v688_v8 = vpop.f32.mrb[5].mxu1 }
 0x17b   :  { %v421_v9 = vmul.f32 0.01, %v417_v7  ;;  %vm420_vm9 = vcmp.gt.f32.partialorder %v417_v7, 0.0 }
 0x17d   :  { %v422_v10 = vsel %vm420_vm9, %v417_v7, %v421_v9 }
 0x17e   :  { %432 = vrot.lane.b32.xlu0 %v422_v10, %s788_s1 }
 0x1bf   :  { %v332_v20 = vpop.f32.mrb[0].mxu0 }
 0x1c0   :  { %v333_v21 = vadd.f32 %v332_v20, %v262_v19  ;;  %v677_v22 = vpop.f32.mrb[1].mxu0 }
 0x1c2   :  { %v337_v25 = vmul.f32 0.01, %v333_v21  ;;  %vm336_vm10 = vcmp.gt.f32.partialorder %v333_v21, 0.0 }
 0x1c4   :  { %v338_v27 = vsel %vm336_vm10, %v333_v21, %v337_v25 }
 0x1c5   :  { %426 = vrot.lane.b32.xlu1 %v338_v27, %s789_s7 }
 0x1f0   :  { %v433_v29 = vpop.permute.xlu0 %432 }
 0x237   :  { %v427_v28 = vpop.permute.xlu1 %426 }
 0x238   :  { %430 = vst.msk [vmem:[#allocation4] sm:$0x3] %vm429_vm11, %v427_v28 }
 0x239   :  { %436 = vst.msk [vmem:[#allocation4] sm:$0x3] %vm435_vm12, %v433_v29 }
 0x240   :  { %v437_v30 = vld [vmem:[#allocation4] sm:$0x3] }
 0x241   :  { %706 = vmatmul.mubr.msk.f32.vlgmr.msra.gmra.mrb[2].mxu0 %vm450_vm13, %v437_v30 }
 0x314   :  { %v520_v35 = vpop.f32.mrb[2].mxu0 }
 0x315   :  { %v521_v36 = vadd.f32 %v520_v35, %v449_v34  ;;  %v707_v37 = vpop.f32.mrb[3].mxu0 }
 0x317   :  { %vm524_vm14 = vcmp.gt.f32.partialorder %v521_v36, 0.0  ;;  %v525_v38 = vmul.f32 0.01, %v521_v36 }
 0x319   :  { %v526_v39 = vsel %vm524_vm14, %v521_v36, %v525_v38 }
 0x31a   :  { %717 = vmatmul.mubr.msk.f32.vlgmr.msra.gmra.mrb[6].mxu1 %vm220_vm5, %v526_v39 }
 0x3ed   :  { %v604_v42 = vpop.f32.mrb[6].mxu1 }
 0x3ee   :  { %v605_v43 = vadd.f32 %v604_v42, %v534_v41  ;;  %v718_v44 = vpop.f32.mrb[7].mxu1 }
 0x3f0   :  { %608 = vst [vmem:[#allocation5] sm:$0x3] %v605_v43 }
 0x3f1   :  { %770 = shalt.err (!%p767_p4)
}
 0x3f2   :  { %s771_s22 = scalar_lea.hbm %s1004_s10, 32 }
 0x3f3   :  { %p772_p5 = scmp.ne.s32.totalorder %s1004_s10, %s771_s22  ;;  %p775_p6 = scmp.lt.u32.totalorder %s771_s22, %s1004_s10 }
 0x3f5   :  { %p777_p7 = pnand %p775_p6, %p772_p5 }
 0x3f7   :  { %780 = shalt.err (!%p777_p7)
}
 0x3f8   :  { %618 = dma.vmem_to_hbm [thread:$0]  %s616_s8, 32, %s1004_s10, [#allocation6]  }
 0x3f9   :  { %781 = dma.done.wait [#allocation6], 32  }
 0x3fa   :  { %782 = vsyncadd [#allocation6], 4294967264 }
 0x3fb   :  { %622 = vsyncpa [#allocation6], 1 }

</bundles_post_ra>
